<compile_context>
chip_gen: v7x
topology: tpu7x:2x2x1
jax: 0.10.0
libtpu: 0.0.40
codegen_flags: <defaults>
</compile_context>

<pallas_src>
import jax
import jax.numpy as jnp
from jax.experimental import pallas as pl
from jax.experimental.pallas import tpu as pltpu

_LANE = 128
_ROW_ALIGN = 16        # sublane alignment; 16 also covers bf16 sublane packing
_MAX_TB = 256          # rows per batch tile; TODO(synk): sweep 128..512 per chip


def _round_up(n, m):
    return ((n + m - 1) // m) * m


def _batch_tiling(batch):
    """(padded_batch, tile_rows, num_tiles).  Idempotent on its own output,
    pad waste <= _ROW_ALIGN-1 rows per tile (no more ~2x rounding)."""
    b = _round_up(max(int(batch), 1), _ROW_ALIGN)
    if b <= _MAX_TB:
        return b, b, 1
    num_tiles = -(-b // _MAX_TB)
    tb = _round_up(-(-b // num_tiles), _ROW_ALIGN)
    return tb * num_tiles, tb, num_tiles


def _ltc_kernel(x_ref, h_ref, wx_ref, wh_ref, bias_ref, inv_tau_ref, out_ref):
    h = h_ref[...]                       # (TB, Hp) f32: epilogue needs full precision
    hp = h.shape[1]                      # static, multiple of 128
    wdt = wx_ref.dtype

    # Fused [gate_lin | lin] = x@Wx + h@Wh + b  -> (TB, 2*Hp), f32 accumulate.
    acc = jnp.dot(x_ref[...].astype(wdt), wx_ref[...],
                  preferred_element_type=jnp.float32)
    acc = acc + jnp.dot(h.astype(wdt), wh_ref[...],
                        preferred_element_type=jnp.float32)
    acc = acc + bias_ref[...]

    # sigmoid = 1/(1+exp(-z)): exp and the approximate reciprocal both run on
    # the EUP slot, off the VPU critical path.
    gate = pl.reciprocal(1.0 + jnp.exp(-acc[:, :hp]), approx=True)
    lin = acc[:, hp:]

    # dh/dt = (-h + lin*gate) * inv_tau ; inv_tau is 0 in padded lanes so the
    # padded output columns are exactly zero.
    out_ref[...] = ((lin * gate - h) * inv_tau_ref[...]).astype(out_ref.dtype)


def prepare_ltc_params(params, input_size, hidden_size, *,
                       weight_dtype=jnp.bfloat16):
    """One-time (outside any ODE step loop) repack of LTCCell parameters.

    Splits each (H, input+H) Linear weight into x/h halves, transposes them so
    the kernel runs plain `act @ W`, fuses gate/main weights along the output
    axis (lane width 2*Hp), pads the hidden axis to a multiple of 128, and
    precomputes 1/clamp(exp(log_tau), 0.001) with zeros in the padded lanes.
    Weights default to bf16 (MXU-native); pass weight_dtype=jnp.float32 for a
    bit-faithful (slower) matmul.
    """
    H = hidden_size
    Hp = _round_up(H, _LANE)
    pad_h = Hp - H

    def split_t(m):                      # (H, input+H) -> (input, H), (H, H)
        return m[:, :input_size].T, m[:, input_size:].T

    wg_x, wg_h = split_t(params["W_gate_w"])
    w_x, w_h = split_t(params["W_w"])

    pad_cols = lambda a: jnp.pad(a, ((0, 0), (0, pad_h)))
    pad_both = lambda a: jnp.pad(a, ((0, pad_h), (0, pad_h)))

    wx = jnp.concatenate([pad_cols(wg_x), pad_cols(w_x)], axis=1)      # (Din, 2Hp)
    wh = jnp.concatenate([pad_both(wg_h), pad_both(w_h)], axis=1)      # (Hp, 2Hp)

    pad_vec = lambda v: jnp.pad(v, (0, pad_h))
    bias = jnp.concatenate([pad_vec(params["W_gate_b"]),
                            pad_vec(params["W_b"])])[None, :]          # (1, 2Hp)

    inv_tau = 1.0 / jnp.maximum(jnp.exp(params["log_tau"]), 0.001)
    inv_tau = jnp.pad(inv_tau, (0, pad_h))[None, :]                    # (1, Hp), 0-padded

    return {
        "wx": wx.astype(weight_dtype),
        "wh": wh.astype(weight_dtype),
        "bias": bias.astype(jnp.float32),
        "inv_tau": inv_tau.astype(jnp.float32),
        "input_size": int(input_size),
        "hidden_size": int(H),
        "hidden_padded": int(Hp),
    }


def pad_ltc_batch(h, x, prepared):
    """Pad (h, x) ONCE to kernel-friendly shapes.  In an ODE/RNN loop call this
    once before the loop, carry the padded state (its padded lanes stay zero),
    and slice the final result once at the end."""
    if h.ndim == 1:
        h = h[None, :]
    if x.ndim == 1:
        x = x[None, :]
    B = h.shape[0]
    H, Hp = prepared["hidden_size"], prepared["hidden_padded"]
    Bp, _, _ = _batch_tiling(B)
    h_pad = jnp.pad(h.astype(jnp.float32), ((0, Bp - B), (0, Hp - H)))
    x_pad = jnp.pad(x.astype(prepared["wx"].dtype), ((0, Bp - B), (0, 0)))
    return h_pad, x_pad, B


def ltc_cell_forward_padded(t, h_pad, x_pad, prepared):
    """Hot-path forward on already padded operands (no per-step pad/slice).

    h_pad : (Bp, Hp) float32, lanes >= hidden_size zero (they stay zero).
    x_pad : (Bp, input_size) in prepared['wx'].dtype.
    Returns dh/dt with the same padded shape as h_pad.
    """
    del t  # unused (ODE time), kept for solver signature parity
    Bp, Hp = h_pad.shape
    Din = prepared["input_size"]
    if Hp != prepared["hidden_padded"]:
        raise ValueError(f"h_pad has {Hp} lanes, expected {prepared['hidden_padded']}")
    if x_pad.shape != (Bp, Din):
        raise ValueError(f"x_pad shape {x_pad.shape} != {(Bp, Din)}")
    Bq, TB, num_tiles = _batch_tiling(Bp)
    if Bq != Bp:
        raise ValueError(
            f"padded batch {Bp} is not kernel-friendly; pad with pad_ltc_batch()")

    wx, wh = prepared["wx"], prepared["wh"]
    bias, inv_tau = prepared["bias"], prepared["inv_tau"]
    wbytes = wx.dtype.itemsize
    xbytes = x_pad.dtype.itemsize

    # VMEM budget from actual block sizes: single-buffered weights +
    # double-buffered x/h/out tiles (+50% / +4MiB slack, never below defaults).
    vmem_needed = ((wx.size + wh.size) * wbytes
                   + (bias.size + inv_tau.size) * 4
                   + 2 * TB * (Din * xbytes + Hp * 4 + Hp * 4))
    vmem_limit = int(min(max(int(vmem_needed * 1.5) + (4 << 20), 32 << 20),
                         128 << 20))

    cost = pl.CostEstimate(
        flops=2 * Bp * (Din + Hp) * (2 * Hp) + 8 * Bp * Hp,
        transcendentals=2 * Bp * Hp,                  # exp + reciprocal per sigmoid
        bytes_accessed=int(Bp * Din * xbytes          # x in
                           + 2 * Bp * Hp * 4          # h in, dhdt out
                           + (wx.size + wh.size) * wbytes
                           + (bias.size + inv_tau.size) * 4),
    )

    def _call(single_buffer_weights):
        # Constant block index -> no need for double buffering of the resident
        # operands (halves weight VMEM, important on v7x's 64 MiB).
        res = {"pipeline_mode": pl.Buffered(1)} if single_buffer_weights else {}
        return pl.pallas_call(
            _ltc_kernel,
            out_shape=jax.ShapeDtypeStruct((Bp, Hp), jnp.float32),
            grid=(num_tiles,),
            in_specs=[
                pl.BlockSpec((TB, Din), lambda i: (i, 0)),            # x tile
                pl.BlockSpec((TB, Hp), lambda i: (i, 0)),             # h tile
                pl.BlockSpec((Din, 2 * Hp), lambda i: (0, 0), **res),  # fused W_x
                pl.BlockSpec((Hp, 2 * Hp), lambda i: (0, 0), **res),   # fused W_h
                pl.BlockSpec((1, 2 * Hp), lambda i: (0, 0), **res),    # fused bias
                pl.BlockSpec((1, Hp), lambda i: (0, 0), **res),        # 1/tau
            ],
            out_specs=pl.BlockSpec((TB, Hp), lambda i: (i, 0)),
            compiler_params=pltpu.CompilerParams(
                dimension_semantics=("parallel",),
                vmem_limit_bytes=vmem_limit),
            cost_estimate=cost,
        )(x_pad, h_pad, wx, wh, bias, inv_tau)

    try:
        return _call(True)
    except Exception:  # pragma: no cover
        # pl.Buffered(1) unsupported on this jax version/backend: fall back to
        # default double-buffered weights (same results, just more VMEM).
        return _call(False)


def ltc_cell_forward(t, h, x, prepared):
    """Drop-in equivalent of LTCCell.forward(t, h, x).

    For ODE/RNN loops prefer pad_ltc_batch() + ltc_cell_forward_padded() so the
    pad/slice HBM round trips happen once, not every step."""
    h_pad, x_pad, B = pad_ltc_batch(h, x, prepared)
    out = ltc_cell_forward_padded(t, h_pad, x_pad, prepared)
    return out[:B, :prepared["hidden_size"]]


def init_ltc_params(key, input_size, hidden_size):
    """Deterministic init mirroring nn.Linear default (U(-1/sqrt(fan_in),..)) + randn log_tau."""
    d = input_size + hidden_size
    k1, k2, k3, k4, k5 = jax.random.split(key, 5)
    bound = 1.0 / (d ** 0.5)
    return {
        "W_gate_w": jax.random.uniform(k1, (hidden_size, d), jnp.float32, -bound, bound),
        "W_gate_b": jax.random.uniform(k2, (hidden_size,), jnp.float32, -bound, bound),
        "W_w":      jax.random.uniform(k3, (hidden_size, d), jnp.float32, -bound, bound),
        "W_b":      jax.random.uniform(k4, (hidden_size,), jnp.float32, -bound, bound),
        "log_tau":  jax.random.normal(k5, (hidden_size,), jnp.float32),
    }


def _reference(h, x, params):
    """Pure-JAX reference (mirrors the PyTorch forward)."""
    if h.ndim == 1:
        h = h[None, :]
    if x.ndim == 1:
        x = x[None, :]
    combined = jnp.concatenate([x, h], axis=1)
    tau = jnp.maximum(jnp.exp(params["log_tau"]), 0.001)
    gate = jax.nn.sigmoid(combined @ params["W_gate_w"].T + params["W_gate_b"])
    lin = combined @ params["W_w"].T + params["W_b"]
    return (-h + lin * gate) / tau


if __name__ == "__main__":
    def run_case(key, input_size, hidden_size, batch, weight_dtype, tol):
        kp, kh, kx = jax.random.split(key, 3)
        params = init_ltc_params(kp, input_size, hidden_size)
        prepared = prepare_ltc_params(params, input_size, hidden_size,
                                      weight_dtype=weight_dtype)
        h = jax.random.normal(kh, (batch, hidden_size), jnp.float32)
        x = jax.random.normal(kx, (batch, input_size), jnp.float32)
        t = jnp.float32(0.0)  # unused by the cell; ODE-solver signature parity

        out = jax.block_until_ready(ltc_cell_forward(t, h, x, prepared))
        assert out.shape == (batch, hidden_size)

        ref = _reference(h, x, params)
        # Compare in numerator units (multiply by tau) so small tau does not
        # amplify the tolerance; bf16 weights / approx sigmoid need slack.
        tau = jnp.maximum(jnp.exp(params["log_tau"]), 0.001)
        err = float(jnp.max(jnp.abs((out - ref) * tau[None, :])))
        assert err < tol, f"scaled error {err} >= {tol} (dtype={weight_dtype})"

    key = jax.random.PRNGKey(0)
    k1, k2, k3 = jax.random.split(key, 3)

    # f32-weight path: tight check of the fusion/padding/epilogue logic.
    run_case(k1, 16, 32, 8, jnp.float32, 3e-2)
    # default bf16 weights, small shapes (matches the module example sizes).
    run_case(k2, 16, 32, 8, jnp.bfloat16, 5e-2)
    # multi-tile grid, batch not a multiple of 8, hidden not a multiple of 128.
    run_case(k3, 24, 200, 260, jnp.bfloat16, 5e-2)

    print("KERNEL_OK")
</pallas_src>

<mosaic_0001>
module attributes {stable_mosaic.version = 11 : i64} {
  func.func @_ltc_kernel(%arg0: i32, %arg1: memref<16x16xf32, #tpu.memory_space<vmem>>, %arg2: memref<16x128xf32, #tpu.memory_space<vmem>>, %arg3: memref<16x256xf32, #tpu.memory_space<vmem>>, %arg4: memref<128x256xf32, #tpu.memory_space<vmem>>, %arg5: memref<1x256xf32, #tpu.memory_space<vmem>>, %arg6: memref<1x128xf32, #tpu.memory_space<vmem>>, %arg7: memref<16x128xf32, #tpu.memory_space<vmem>>) attributes {dimension_semantics = [#tpu.dimension_semantics<parallel>], iteration_bounds = array<i64: 1>, scalar_prefetch = 0 : i64, scratch_operands = 0 : i64, tpu.core_type = #tpu.core_type<tc>, window_params = [{transform_indices = @transform_0, window_bounds = array<i64: 16, 16>}, {transform_indices = @transform_1, window_bounds = array<i64: 16, 128>}, {pipeline_mode = #tpu.pipeline_mode<synchronous>, transform_indices = @transform_2, window_bounds = array<i64: 16, 256>}, {pipeline_mode = #tpu.pipeline_mode<synchronous>, transform_indices = @transform_3, window_bounds = array<i64: 128, 256>}, {pipeline_mode = #tpu.pipeline_mode<synchronous>, transform_indices = @transform_4, window_bounds = array<i64: 1, 256>}, {pipeline_mode = #tpu.pipeline_mode<synchronous>, transform_indices = @transform_5, window_bounds = array<i64: 1, 128>}, {transform_indices = @transform_6, window_bounds = array<i64: 16, 128>}]} {
    %c0 = arith.constant 0 : index
    %c0_0 = arith.constant 0 : index
    %0 = vector.load %arg2[%c0, %c0_0] : memref<16x128xf32, #tpu.memory_space<vmem>>, vector<16x128xf32>
    %c0_1 = arith.constant 0 : index
    %c0_2 = arith.constant 0 : index
    %1 = vector.load %arg1[%c0_1, %c0_2] : memref<16x16xf32, #tpu.memory_space<vmem>>, vector<16x16xf32>
    %c0_3 = arith.constant 0 : index
    %c0_4 = arith.constant 0 : index
    %2 = vector.load %arg3[%c0_3, %c0_4] : memref<16x256xf32, #tpu.memory_space<vmem>>, vector<16x256xf32>
    %cst = arith.constant dense<0.000000e+00> : vector<16x256xf32>
    %3 = tpu.matmul %1, %2, %cst {dimension_numbers = #tpu.dot_dimension_numbers<[1], [0], [0], [1], [0, 0, 1, 1], [], []>} : vector<16x16xf32>, vector<16x256xf32>, vector<16x256xf32> -> vector<16x256xf32>
    %c0_5 = arith.constant 0 : index
    %c0_6 = arith.constant 0 : index
    %4 = vector.load %arg4[%c0_5, %c0_6] : memref<128x256xf32, #tpu.memory_space<vmem>>, vector<128x256xf32>
    %cst_7 = arith.constant dense<0.000000e+00> : vector<16x256xf32>
    %5 = tpu.matmul %0, %4, %cst_7 {dimension_numbers = #tpu.dot_dimension_numbers<[1], [0], [0], [1], [0, 0, 1, 1], [], []>} : vector<16x128xf32>, vector<128x256xf32>, vector<16x256xf32> -> vector<16x256xf32>
    %6 = arith.addf %3, %5 : vector<16x256xf32>
    %c0_8 = arith.constant 0 : index
    %c0_9 = arith.constant 0 : index
    %7 = vector.load %arg5[%c0_8, %c0_9] : memref<1x256xf32, #tpu.memory_space<vmem>>, vector<1x256xf32>
    %8 = vector.broadcast %7 : vector<1x256xf32> to vector<16x256xf32>
    %9 = arith.addf %6, %8 : vector<16x256xf32>
    %10 = vector.extract_strided_slice %9 {offsets = [0, 0], sizes = [16, 128], strides = [1, 1]} : vector<16x256xf32> to vector<16x128xf32>
    %cst_10 = arith.constant 0.000000e+00 : f32
    %11 = vector.broadcast %cst_10 : f32 to vector<16x128xf32>
    %12 = arith.subf %11, %10 : vector<16x128xf32>
    %13 = math.exp %12 : vector<16x128xf32>
    %cst_11 = arith.constant 1.000000e+00 : f32
    %14 = vector.broadcast %cst_11 : f32 to vector<16x128xf32>
    %15 = arith.addf %14, %13 : vector<16x128xf32>
    %16 = tpu.reciprocal %15 {approx = true} : vector<16x128xf32> -> vector<16x128xf32>
    %17 = vector.extract_strided_slice %9 {offsets = [0, 128], sizes = [16, 128], strides = [1, 1]} : vector<16x256xf32> to vector<16x128xf32>
    %18 = arith.mulf %17, %16 : vector<16x128xf32>
    %19 = arith.subf %18, %0 : vector<16x128xf32>
    %c0_12 = arith.constant 0 : index
    %c0_13 = arith.constant 0 : index
    %20 = vector.load %arg6[%c0_12, %c0_13] : memref<1x128xf32, #tpu.memory_space<vmem>>, vector<1x128xf32>
    %21 = vector.broadcast %20 : vector<1x128xf32> to vector<16x128xf32>
    %22 = arith.mulf %19, %21 : vector<16x128xf32>
    %c0_14 = arith.constant 0 : index
    %c0_15 = arith.constant 0 : index
    %23 = vector.load %arg7[%c0_14, %c0_15] : memref<16x128xf32, #tpu.memory_space<vmem>>, vector<16x128xf32>
    tpu.vector_store %arg7[%c0_14, %c0_15], %22 {strides = array<i32>} : memref<16x128xf32, #tpu.memory_space<vmem>>, vector<16x128xf32>,
    return
  }
  func.func @transform_0(%arg0: i32) -> (i32, i32) {
    %c0_i32 = arith.constant 0 : i32
    %c0_i32_0 = arith.constant 0 : i32
    return %arg0, %c0_i32 : i32, i32
  }
  func.func @transform_1(%arg0: i32) -> (i32, i32) {
    %c0_i32 = arith.constant 0 : i32
    %c0_i32_0 = arith.constant 0 : i32
    return %arg0, %c0_i32 : i32, i32
  }
  func.func @transform_2(%arg0: i32) -> (i32, i32) {
    %c0_i32 = arith.constant 0 : i32
    %c0_i32_0 = arith.constant 0 : i32
    %c0_i32_1 = arith.constant 0 : i32
    return %c0_i32, %c0_i32_0 : i32, i32
  }
  func.func @transform_3(%arg0: i32) -> (i32, i32) {
    %c0_i32 = arith.constant 0 : i32
    %c0_i32_0 = arith.constant 0 : i32
    %c0_i32_1 = arith.constant 0 : i32
    return %c0_i32, %c0_i32_0 : i32, i32
  }
  func.func @transform_4(%arg0: i32) -> (i32, i32) {
    %c0_i32 = arith.constant 0 : i32
    %c0_i32_0 = arith.constant 0 : i32
    %c0_i32_1 = arith.constant 0 : i32
    return %c0_i32, %c0_i32_0 : i32, i32
  }
  func.func @transform_5(%arg0: i32) -> (i32, i32) {
    %c0_i32 = arith.constant 0 : i32
    %c0_i32_0 = arith.constant 0 : i32
    %c0_i32_1 = arith.constant 0 : i32
    return %c0_i32, %c0_i32_0 : i32, i32
  }
  func.func @transform_6(%arg0: i32) -> (i32, i32) {
    %c0_i32 = arith.constant 0 : i32
    %c0_i32_0 = arith.constant 0 : i32
    return %arg0, %c0_i32 : i32, i32
  }
}

module attributes {stable_mosaic.version = 11 : i64} {
  func.func @_ltc_kernel(%arg0: i32, %arg1: memref<16x16xf32, #tpu.memory_space<vmem>>, %arg2: memref<16x128xf32, #tpu.memory_space<vmem>>, %arg3: memref<16x256xf32, #tpu.memory_space<vmem>>, %arg4: memref<128x256xf32, #tpu.memory_space<vmem>>, %arg5: memref<1x256xf32, #tpu.memory_space<vmem>>, %arg6: memref<1x128xf32, #tpu.memory_space<vmem>>, %arg7: memref<16x128xf32, #tpu.memory_space<vmem>>) attributes {dimension_semantics = [#tpu.dimension_semantics<parallel>], iteration_bounds = array<i64: 1>, scalar_prefetch = 0 : i64, scratch_operands = 0 : i64, tpu.core_type = #tpu.core_type<tc>, window_params = [{transform_indices = @transform_0, window_bounds = array<i64: 16, 16>}, {transform_indices = @transform_1, window_bounds = array<i64: 16, 128>}, {pipeline_mode = #tpu.pipeline_mode<synchronous>, transform_indices = @transform_2, window_bounds = array<i64: 16, 256>}, {pipeline_mode = #tpu.pipeline_mode<synchronous>, transform_indices = @transform_3, window_bounds = array<i64: 128, 256>}, {pipeline_mode = #tpu.pipeline_mode<synchronous>, transform_indices = @transform_4, window_bounds = array<i64: 1, 256>}, {pipeline_mode = #tpu.pipeline_mode<synchronous>, transform_indices = @transform_5, window_bounds = array<i64: 1, 128>}, {transform_indices = @transform_6, window_bounds = array<i64: 16, 128>}]} {
    %c0 = arith.constant 0 : index
    %c0_0 = arith.constant 0 : index
    %0 = vector.load %arg2[%c0, %c0_0] : memref<16x128xf32, #tpu.memory_space<vmem>>, vector<16x128xf32>
    %c0_1 = arith.constant 0 : index
    %c0_2 = arith.constant 0 : index
    %1 = vector.load %arg1[%c0_1, %c0_2] : memref<16x16xf32, #tpu.memory_space<vmem>>, vector<16x16xf32>
    %c0_3 = arith.constant 0 : index
    %c0_4 = arith.constant 0 : index
    %2 = vector.load %arg3[%c0_3, %c0_4] : memref<16x256xf32, #tpu.memory_space<vmem>>, vector<16x256xf32>
    %cst = arith.constant dense<0.000000e+00> : vector<16x256xf32>
    %3 = tpu.matmul %1, %2, %cst {dimension_numbers = #tpu.dot_dimension_numbers<[1], [0], [0], [1], [0, 0, 1, 1], [], []>} : vector<16x16xf32>, vector<16x256xf32>, vector<16x256xf32> -> vector<16x256xf32>
    %c0_5 = arith.constant 0 : index
    %c0_6 = arith.constant 0 : index
    %4 = vector.load %arg4[%c0_5, %c0_6] : memref<128x256xf32, #tpu.memory_space<vmem>>, vector<128x256xf32>
    %cst_7 = arith.constant dense<0.000000e+00> : vector<16x256xf32>
    %5 = tpu.matmul %0, %4, %cst_7 {dimension_numbers = #tpu.dot_dimension_numbers<[1], [0], [0], [1], [0, 0, 1, 1], [], []>} : vector<16x128xf32>, vector<128x256xf32>, vector<16x256xf32> -> vector<16x256xf32>
    %6 = arith.addf %3, %5 : vector<16x256xf32>
    %c0_8 = arith.constant 0 : index
    %c0_9 = arith.constant 0 : index
    %7 = vector.load %arg5[%c0_8, %c0_9] : memref<1x256xf32, #tpu.memory_space<vmem>>, vector<1x256xf32>
    %8 = vector.broadcast %7 : vector<1x256xf32> to vector<16x256xf32>
    %9 = arith.addf %6, %8 : vector<16x256xf32>
    %10 = vector.extract_strided_slice %9 {offsets = [0, 0], sizes = [16, 128], strides = [1, 1]} : vector<16x256xf32> to vector<16x128xf32>
    %cst_10 = arith.constant 0.000000e+00 : f32
    %11 = vector.broadcast %cst_10 : f32 to vector<16x128xf32>
    %12 = arith.subf %11, %10 : vector<16x128xf32>
    %13 = math.exp %12 : vector<16x128xf32>
    %cst_11 = arith.constant 1.000000e+00 : f32
    %14 = vector.broadcast %cst_11 : f32 to vector<16x128xf32>
    %15 = arith.addf %14, %13 : vector<16x128xf32>
    %16 = tpu.reciprocal %15 {approx = true} : vector<16x128xf32> -> vector<16x128xf32>
    %17 = vector.extract_strided_slice %9 {offsets = [0, 128], sizes = [16, 128], strides = [1, 1]} : vector<16x256xf32> to vector<16x128xf32>
    %18 = arith.mulf %17, %16 : vector<16x128xf32>
    %19 = arith.subf %18, %0 : vector<16x128xf32>
    %c0_12 = arith.constant 0 : index
    %c0_13 = arith.constant 0 : index
    %20 = vector.load %arg6[%c0_12, %c0_13] : memref<1x128xf32, #tpu.memory_space<vmem>>, vector<1x128xf32>
    %21 = vector.broadcast %20 : vector<1x128xf32> to vector<16x128xf32>
    %22 = arith.mulf %19, %21 : vector<16x128xf32>
    %c0_14 = arith.constant 0 : index
    %c0_15 = arith.constant 0 : index
    %23 = vector.load %arg7[%c0_14, %c0_15] : memref<16x128xf32, #tpu.memory_space<vmem>>, vector<16x128xf32>
    tpu.vector_store %arg7[%c0_14, %c0_15], %22 {strides = array<i32>} : memref<16x128xf32, #tpu.memory_space<vmem>>, vector<16x128xf32>,
    return
  }
  func.func @transform_0(%arg0: i32) -> (i32, i32) {
    %c0_i32 = arith.constant 0 : i32
    %c0_i32_0 = arith.constant 0 : i32
    return %arg0, %c0_i32 : i32, i32
  }
  func.func @transform_1(%arg0: i32) -> (i32, i32) {
    %c0_i32 = arith.constant 0 : i32
    %c0_i32_0 = arith.constant 0 : i32
    return %arg0, %c0_i32 : i32, i32
  }
  func.func @transform_2(%arg0: i32) -> (i32, i32) {
    %c0_i32 = arith.constant 0 : i32
    %c0_i32_0 = arith.constant 0 : i32
    %c0_i32_1 = arith.constant 0 : i32
    return %c0_i32, %c0_i32_0 : i32, i32
  }
  func.func @transform_3(%arg0: i32) -> (i32, i32) {
    %c0_i32 = arith.constant 0 : i32
    %c0_i32_0 = arith.constant 0 : i32
    %c0_i32_1 = arith.constant 0 : i32
    return %c0_i32, %c0_i32_0 : i32, i32
  }
  func.func @transform_4(%arg0: i32) -> (i32, i32) {
    %c0_i32 = arith.constant 0 : i32
    %c0_i32_0 = arith.constant 0 : i32
    %c0_i32_1 = arith.constant 0 : i32
    return %c0_i32, %c0_i32_0 : i32, i32
  }
  func.func @transform_5(%arg0: i32) -> (i32, i32) {
    %c0_i32 = arith.constant 0 : i32
    %c0_i32_0 = arith.constant 0 : i32
    %c0_i32_1 = arith.constant 0 : i32
    return %c0_i32, %c0_i32_0 : i32, i32
  }
  func.func @transform_6(%arg0: i32) -> (i32, i32) {
    %c0_i32 = arith.constant 0 : i32
    %c0_i32_0 = arith.constant 0 : i32
    return %arg0, %c0_i32 : i32, i32
  }
}

</mosaic_0001>

<bundles_post_ra>
// kernel: tpu_custom_call.1
= control target key start
LH: loop header
LB: loop body
LE: loop exit
PB: predicated region body
PF: predicated region fallthrough
CT: control target
= control target key end

     0   :  { %11 = vsyncpa [#allocation3], 0  ;;  %s652_s0 = inlined_call_operand.hbm [shape: f32[16,16], index: 0, kind: input, shape index: {}]   ;;  %s653_s1 = inlined_call_operand.hbm [shape: f32[16,128], index: 1, kind: input, shape index: {}]   ;;  %s654_s2 = inlined_call_operand.hbm [shape: f32[16,256], index: 2, kind: input, shape index: {}]   ;;  %s655_s3 = inlined_call_operand.hbm [shape: f32[128,256], index: 3, kind: input, shape index: {}]   ;;  %s656_s4 = inlined_call_operand.vmem [shape: f32[1,256], index: 4, kind: input, shape index: {}]   ;;  %s657_s5 = inlined_call_operand.vmem [shape: f32[1,128], index: 5, kind: input, shape index: {}]   ;;  %s658_s6 = inlined_call_operand.hbm [shape: f32[16,128], index: 6, kind: output, shape index: {}]  }
   0x1   :  { %12 = vsyncpa [#allocation6], 0 }
   0x2   :  { %13 = vsyncpa [#allocation9], 0 }
   0x3   :  { %14 = vsyncpa [#allocation4], 0  ;;  %s519_s21 = smov [#allocation5]   ;;  %s520_s23 = smov [#allocation2]  }
   0x4   :  { %s32_s22 = sshll.u32 %s519_s21, 4  ;;  %s20_s24 = sshll.u32 %s520_s23, 4  ;;  %s33_s22 = int_to_ptr.vmem [resolvable:$true] %s32_s22  ;;  %s564_s24 = int_to_ptr.vmem [resolvable:$true] %s20_s24 }
   0x5   :  { %s401_s27 = scalar_lea.hbm %s653_s1, 256 }
   0x6   :  { %p402_p0 = scmp.ne.s32.totalorder %s653_s1, %s401_s27  ;;  %p405_p1 = scmp.lt.u32.totalorder %s401_s27, %s653_s1 }
   0x8   :  { %p407_p2 = pnand %p405_p1, %p402_p0 }
   0xa   :  { %410 = shalt.err (!%p407_p2)
}
   0xb   :  { %s411_s8 = scalar_lea.vmem %s33_s22, 256  ;;  %p416_p4 = scmp.lt.s32.totalorder %s33_s22, %s33_s22 }
   0xc   :  { %p412_p3 = scmp.ne.s32.totalorder %s33_s22, %s411_s8  ;;  %p417_p5 = scmp.lt.s32.totalorder %s411_s8, %s411_s8 }
   0xe   :  { %p418_p6 = por %p417_p5, %p416_p4 }
  0x10   :  { %p419_p7 = pnand %p418_p6, %p412_p3 }
  0x12   :  { %422 = shalt.err (!%p419_p7)
}
  0x13   :  { %s521_s9 = smov 128   ;;  %s522_s10 = smov 8  }
  0x14   :  { %38 = dma.hbm_to_vmem [thread:$0]  %s653_s1, 256, %s33_s22, [#allocation6], %s521_s9, %s521_s9, %s522_s10  }
  0x15   :  { %s423_s15 = scalar_lea.hbm %s652_s0, 256 }
  0x16   :  { %p424_p8 = scmp.ne.s32.totalorder %s652_s0, %s423_s15  ;;  %p427_p9 = scmp.lt.u32.totalorder %s423_s15, %s652_s0 }
  0x18   :  { %p429_p10 = pnand %p427_p9, %p424_p8 }
  0x1a   :  { %432 = shalt.err (!%p429_p10)
}
  0x1b   :  { %s433_s20 = scalar_lea.vmem %s564_s24, 256  ;;  %p438_p12 = scmp.lt.s32.totalorder %s564_s24, %s564_s24 }
  0x1c   :  { %p434_p11 = scmp.ne.s32.totalorder %s564_s24, %s433_s20  ;;  %p439_p13 = scmp.lt.s32.totalorder %s433_s20, %s433_s20 }
  0x1e   :  { %p440_p0 = por %p439_p13, %p438_p12 }
  0x20   :  { %p441_p1 = pnand %p440_p0, %p434_p11 }
  0x22   :  { %444 = shalt.err (!%p441_p1)
}
  0x23   :  { %26 = dma.hbm_to_vmem [thread:$0]  %s652_s0, 256, %s564_s24, [#allocation3], %s521_s9, %s521_s9, %s522_s10  }
  0x24   :  { %s523_s22 = smov [#allocation7]   ;;  %s445_s27 = scalar_lea.hbm %s654_s2, 512 }
  0x25   :  { %s44_s23 = sshll.u32 %s523_s22, 4  ;;  %p446_p2 = scmp.ne.s32.totalorder %s654_s2, %s445_s27  ;;  %s45_s23 = int_to_ptr.vmem [resolvable:$true] %s44_s23 }
  0x26   :  { %p449_p3 = scmp.lt.u32.totalorder %s445_s27, %s654_s2 }
  0x28   :  { %p451_p4 = pnand %p449_p3, %p446_p2 }
  0x2a   :  { %454 = shalt.err (!%p451_p4)
}
  0x2b   :  { %s455_s8 = scalar_lea.vmem %s45_s23, 512  ;;  %p460_p6 = scmp.lt.s32.totalorder %s45_s23, %s45_s23 }
  0x2c   :  { %p456_p5 = scmp.ne.s32.totalorder %s45_s23, %s455_s8  ;;  %p461_p7 = scmp.lt.s32.totalorder %s455_s8, %s455_s8 }
  0x2e   :  { %p462_p8 = por %p461_p7, %p460_p6 }
  0x30   :  { %p463_p9 = pnand %p462_p8, %p456_p5 }
  0x32   :  { %466 = shalt.err (!%p463_p9)
}
  0x33   :  { %s524_s0 = smov 256   ;;  %s525_s24 = smov 16  }
  0x34   :  { %50 = dma.hbm_to_vmem [thread:$0]  %s654_s2, 512, %s45_s23, [#allocation6], %s524_s0, %s524_s0, %s525_s24  }
  0x35   :  { %s526_s13 = smov [#allocation8]   ;;  %s467_s17 = scalar_lea.hbm %s655_s3, 4096 }
  0x36   :  { %s56_s14 = sshll.u32 %s526_s13, 4  ;;  %p468_p10 = scmp.ne.s32.totalorder %s655_s3, %s467_s17  ;;  %s57_s14 = int_to_ptr.vmem [resolvable:$true] %s56_s14 }
  0x37   :  { %p471_p11 = scmp.lt.u32.totalorder %s467_s17, %s655_s3 }
  0x39   :  { %p473_p12 = pnand %p471_p11, %p468_p10 }
  0x3b   :  { %476 = shalt.err (!%p473_p12)
}
  0x3c   :  { %s477_s21 = scalar_lea.vmem %s57_s14, 4096  ;;  %p482_p0 = scmp.lt.s32.totalorder %s57_s14, %s57_s14 }
  0x3d   :  { %p478_p13 = scmp.ne.s32.totalorder %s57_s14, %s477_s21  ;;  %p483_p1 = scmp.lt.s32.totalorder %s477_s21, %s477_s21 }
  0x3f   :  { %p484_p2 = por %p483_p1, %p482_p0 }
  0x41   :  { %p485_p3 = pnand %p484_p2, %p478_p13 }
  0x43   :  { %488 = shalt.err (!%p485_p3)
}
  0x44   :  { %62 = dma.hbm_to_vmem [thread:$0]  %s655_s3, 4096, %s57_s14, [#allocation9], %s524_s0, %s524_s0, %s525_s24  }
  0x45   :  { %511 = dma.done.wait [#allocation3], 256  }
  0x46   :  { %512 = vsyncadd [#allocation3], 4294967040 }
  0x47   :  { %513 = dma.done.wait [#allocation6], 768  }
  0x48   :  { %514 = vsyncadd [#allocation6], 4294966528 }
  0x49   :  { %515 = dma.done.wait [#allocation9], 4096  }
  0x4a   :  { %516 = vsyncadd [#allocation9], 4294963200  ;;  %v527_v0 = vmov 0.0   ;;  %v88_v1 = vld [vmem:[#allocation8 + $0x8] sm:$0xff]  ;;  %v90_v2 = vld [vmem:[#allocation8 + $0x18] sm:$0xff]  ;;  %vm196_vm0 = vcmask 130048   ;;  %v282_v62 = vlaneseq }
  0x4b   :  { %267 = vmatprep.mubr.f32.mxu0 %v527_v0  ;;  %183 = vmatprep.mubr.f32.mxu1 %v527_v0  ;;  %v87_v3 = vld [vmem:[#allocation8] sm:$0xff]  ;;  %v343_v4 = vpack.c.bf16 %v90_v2, %v88_v1  ;;  %v89_v5 = vld [vmem:[#allocation8 + $0x10] sm:$0xff]  ;;  %v92_v6 = vld [vmem:[#allocation8 + $0x28] sm:$0xff]  ;;  %s528_s26 = smov [#allocation10]  }
  0x4c   :  { %v94_v7 = vld [vmem:[#allocation8 + $0x38] sm:$0xff]  ;;  %v345_v8 = vpack.c.bf16 %v89_v5, %v87_v3  ;;  %v91_v10 = vld [vmem:[#allocation8 + $0x20] sm:$0xff]  ;;  %v93_v11 = vld [vmem:[#allocation8 + $0x30] sm:$0xff]  ;;  %v283_v1 = vshrl.u32 %v282_v62, 7  ;;  %s326_s27 = sshll.u32 %s528_s26, 4  ;;  %s327_s27 = int_to_ptr.vmem [resolvable:$true] %s326_s27 }
  0x4d   :  { %v347_v9 = vpack.c.bf16 %v94_v7, %v92_v6  ;;  %v96_v12 = vld [vmem:[#allocation8 + $0x48] sm:$0xff]  ;;  %344 = vmatprep.subr.bf16.mxu1 %v343_v4  ;;  %v98_v13 = vld [vmem:[#allocation8 + $0x58] sm:$0xff]  ;;  %v349_v14 = vpack.c.bf16 %v93_v11, %v91_v10  ;;  %v95_v16 = vld [vmem:[#allocation8 + $0x40] sm:$0xff]  ;;  %s489_s28 = scalar_lea.vmem %s327_s27, 256  ;;  %p494_p5 = scmp.lt.s32.totalorder %s327_s27, %s327_s27 }
  0x4e   :  { %346 = vmatpush1.bf16.msra.mxu1 %v345_v8  ;;  %v351_v15 = vpack.c.bf16 %v98_v13, %v96_v12  ;;  %v97_v17 = vld [vmem:[#allocation8 + $0x50] sm:$0xff]  ;;  %v100_v18 = vld [vmem:[#allocation8 + $0x68] sm:$0xff]  ;;  %v102_v19 = vld [vmem:[#allocation8 + $0x78] sm:$0xff]  ;;  %v284_v2 = vsub.s32 0, %v283_v1  ;;  %p490_p4 = scmp.ne.s32.totalorder %s327_s27, %s489_s28  ;;  %p495_p6 = scmp.lt.s32.totalorder %s489_s28, %s489_s28 }
  0x4f   :  { %348 = vmatprep.subr.bf16.mxu1 %v347_v9  ;;  %v353_v20 = vpack.c.bf16 %v97_v17, %v95_v16  ;;  %v99_v21 = vld [vmem:[#allocation8 + $0x60] sm:$0xff]  ;;  %v355_v22 = vpack.c.bf16 %v102_v19, %v100_v18  ;;  %v101_v23 = vld [vmem:[#allocation8 + $0x70] sm:$0xff]  ;;  %v84_v24 = vld [vmem:[#allocation7 + $0x8] sm:$0xff] }
  0x50   :  { %v86_v25 = vld [vmem:[#allocation7 + $0x18] sm:$0xff]  ;;  %v104_v26 = vld [vmem:[#allocation8 + $0x88] sm:$0xff]  ;;  %v83_v29 = vld [vmem:[#allocation7] sm:$0xff]  ;;  %v357_v31 = vpack.c.bf16 %v101_v23, %v99_v21  ;;  %v288_v21 = vsub.s32 1, %v283_v1  ;;  %p496_p7 = por %p495_p6, %p494_p5 }
  0x51   :  { %v106_v27 = vld [vmem:[#allocation8 + $0x98] sm:$0xff]  ;;  %v375_v28 = vpack.c.bf16 %v86_v25, %v84_v24  ;;  %v85_v30 = vld [vmem:[#allocation7 + $0x10] sm:$0xff]  ;;  %v103_v34 = vld [vmem:[#allocation8 + $0x80] sm:$0xff] }
  0x52   :  { %350 = vmatpush1.bf16.msra.mxu1 %v349_v14  ;;  %v377_v32 = vpack.c.bf16 %v85_v30, %v83_v29  ;;  %v359_v33 = vpack.c.bf16 %v106_v27, %v104_v26  ;;  %v105_v35 = vld [vmem:[#allocation8 + $0x90] sm:$0xff]  ;;  %v108_v36 = vld [vmem:[#allocation8 + $0xa8] sm:$0xff]  ;;  %v110_v37 = vld [vmem:[#allocation8 + $0xb8] sm:$0xff]  ;;  %p497_p8 = pnand %p496_p7, %p490_p4 }
  0x53   :  { %352 = vmatprep.subr.bf16.mxu1 %v351_v15  ;;  %376 = vmatprep.subr.bf16.mxu0 %v375_v28  ;;  %v81_v38 = vld [vmem:[#allocation2] sm:$0xff]  ;;  %v361_v39 = vpack.c.bf16 %v105_v35, %v103_v34  ;;  %v363_v40 = vpack.c.bf16 %v110_v37, %v108_v36  ;;  %v109_v42 = vld [vmem:[#allocation8 + $0xb0] sm:$0xff]  ;;  %v112_v43 = vld [vmem:[#allocation8 + $0xc8] sm:$0xff] }
  0x54   :  { %378 = vmatpush1.bf16.msra.mxu0 %v377_v32  ;;  %v107_v41 = vld [vmem:[#allocation8 + $0xa0] sm:$0xff]  ;;  %v114_v44 = vld [vmem:[#allocation8 + $0xd8] sm:$0xff]  ;;  %v82_v45 = vld [vmem:[#allocation2 + $0x8] sm:$0xff] }
  0x55   :  { %v365_v46 = vpack.c.bf16 %v109_v42, %v107_v41  ;;  %v367_v47 = vpack.c.bf16 %v114_v44, %v112_v43  ;;  %v111_v48 = vld [vmem:[#allocation8 + $0xc0] sm:$0xff]  ;;  %v113_v49 = vld [vmem:[#allocation8 + $0xd0] sm:$0xff]  ;;  %v116_v50 = vld [vmem:[#allocation8 + $0xe8] sm:$0xff] }
  0x56   :  { %354 = vmatpush1.bf16.msra.mxu1 %v353_v20  ;;  %v118_v51 = vld [vmem:[#allocation8 + $0xf8] sm:$0xff]  ;;  %v369_v52 = vpack.c.bf16 %v113_v49, %v111_v48  ;;  %v115_v54 = vld [vmem:[#allocation8 + $0xe0] sm:$0xff]  ;;  %v117_v55 = vld [vmem:[#allocation8 + $0xf0] sm:$0xff] }
  0x57   :  { %356 = vmatprep.subr.bf16.mxu1 %v355_v22  ;;  %340 = vmatmul.mubr.msk.f32.vlgmr.msra.gmra.mrb[0].mxu0 %vm196_vm0, %v81_v38  ;;  %v371_v53 = vpack.c.bf16 %v118_v51, %v116_v50  ;;  %v373_v56 = vpack.c.bf16 %v117_v55, %v115_v54  ;;  %v79_v57 = vld [vmem:[#allocation5] sm:$0xff]  ;;  %v80_v58 = vld [vmem:[#allocation5 + $0x8] sm:$0xff]  ;;  %v280_v3 = vld [vmem:[%s656_s4] sm:$0x3] }
  0x58   :  { %273 = vmatprep.mubr.f32.mxu0 %v527_v0  ;;  %v285_v4 = vrot.slane %v280_v3, %v284_v2  ;;  %v289_v23 = vrot.slane %v280_v3, %v288_v21  ;;  %v342_v27 = vld [vmem:[%s657_s5] ss:$0 sm:$0xff] }
  0x5a   :  { %358 = vmatpush1.bf16.msra.mxu1 %v357_v31 }
  0x5b   :  { %360 = vmatprep.subr.bf16.mxu1 %v359_v33  ;;  %341 = vmatmul.mubr.msk.f32.gmra.mrb[2].mxu0 %vm196_vm0, %v82_v45 }
  0x5e   :  { %362 = vmatpush1.bf16.msra.mxu1 %v361_v39 }
  0x5f   :  { %364 = vmatprep.subr.bf16.mxu1 %v363_v40 }
  0x62   :  { %366 = vmatpush1.bf16.msra.mxu1 %v365_v46 }
  0x63   :  { %368 = vmatprep.subr.bf16.mxu1 %v367_v47 }
  0x66   :  { %370 = vmatpush1.bf16.msra.mxu1 %v369_v52 }
  0x67   :  { %372 = vmatprep.subr.bf16.mxu1 %v371_v53 }
  0x6a   :  { %374 = vmatpush1.bf16.msra.mxu1 %v373_v56 }
  0x6d   :  { %184 = vmatmul.mubr.f32.vlgmr.msra.gmra.mrb[0].mxu1 %v79_v57 }
  0x6e   :  { %189 = vmatprep.mubr.f32.mxu1 %v527_v0 }
  0x71   :  { %190 = vmatmul.mubr.f32.gmra.mrb[2].mxu1 %v80_v58 }
 0x12a   :  { %v269_v59 = vpop.f32.mrb[0].mxu0 }
 0x12b   :  { %v271_v60 = vpop.f32.mrb[1].mxu0 }
 0x12e   :  { %v275_v61 = vpop.f32.mrb[2].mxu0 }
 0x12f   :  { %v277_v63 = vpop.f32.mrb[3].mxu0 }
 0x140   :  { %v185_v5 = vpop.f32.mrb[0].mxu1 }
 0x141   :  { %v270_v6 = vadd.f32 %v269_v59, %v185_v5  ;;  %v187_v7 = vpop.f32.mrb[1].mxu1 }
 0x142   :  { %v272_v8 = vadd.f32 %v271_v60, %v187_v7 }
 0x143   :  { %v292_v9 = vadd.f32 %v285_v4, %v270_v6 }
 0x144   :  { %v191_v0 = vpop.f32.mrb[2].mxu1  ;;  %v293_v24 = vadd.f32 %v289_v23, %v272_v8 }
 0x145   :  { %v296_v10 = vsub.f32 0.0, %v292_v9  ;;  %v276_v11 = vadd.f32 %v275_v61, %v191_v0  ;;  %v193_v12 = vpop.f32.mrb[3].mxu1 }
 0x146   :  { %v278_v13 = vadd.f32 %v277_v63, %v193_v12 }
 0x147   :  { %v298_v14 = vmul.f32 1.442695, %v296_v10  ;;  %v294_v15 = vadd.f32 %v285_v4, %v276_v11 }
 0x148   :  { %v295_v29 = vadd.f32 %v289_v23, %v278_v13 }
 0x149   :  { %393 = vpow2.f32 %v298_v14  ;;  %v297_v16 = vsub.f32 0.0, %v294_v15 }
 0x14b   :  { %v300_v17 = vmul.f32 1.442695, %v297_v16 }
 0x14d   :  { %395 = vpow2.f32 %v300_v17 }
 0x153   :  { %v394_v18 = vpop.eup %393 }
 0x154   :  { %v302_v19 = vadd.f32 1.0, %v394_v18 }
 0x156   :  { %397 = vrcp.f32 %v302_v19 }
 0x157   :  { %v396_v20 = vpop.eup %395 }
 0x158   :  { %v303_v22 = vadd.f32 1.0, %v396_v20 }
 0x15a   :  { %399 = vrcp.f32 %v303_v22 }
 0x160   :  { %v398_v25 = vpop.eup %397 }
 0x161   :  { %v306_v26 = vmul.f32 %v398_v25, %v293_v24 }
 0x163   :  { %v308_v28 = vsub.f32 %v306_v26, %v79_v57 }
 0x164   :  { %v400_v30 = vpop.eup %399 }
 0x165   :  { %v307_v31 = vmul.f32 %v400_v30, %v295_v29  ;;  %v317_v32 = vmul.f32 %v342_v27, %v308_v28 }
 0x167   :  { %v309_v33 = vsub.f32 %v307_v31, %v80_v58  ;;  %319 = vst [vmem:[#allocation10] sm:$0xff] %v317_v32 }
 0x169   :  { %v318_v34 = vmul.f32 %v342_v27, %v309_v33 }
 0x16b   :  { %320 = vst [vmem:[#allocation10 + $0x8] sm:$0xff] %v318_v34 }
 0x16c   :  { %500 = shalt.err (!%p497_p8)
}
 0x16d   :  { %s501_s30 = scalar_lea.hbm %s658_s6, 256 }
 0x16e   :  { %p502_p9 = scmp.ne.s32.totalorder %s658_s6, %s501_s30  ;;  %p505_p10 = scmp.lt.u32.totalorder %s501_s30, %s658_s6 }
 0x170   :  { %p507_p11 = pnand %p505_p10, %p502_p9 }
 0x172   :  { %510 = shalt.err (!%p507_p11)
}
 0x173   :  { %332 = dma.vmem_to_hbm [thread:$0]  %s327_s27, 256, %s658_s6, [#allocation4], %s521_s9, %s521_s9, %s522_s10  }
 0x174   :  { %517 = dma.done.wait [#allocation4], 256  }
 0x175   :  { %518 = vsyncadd [#allocation4], 4294967040 }
 0x176   :  { %336 = vsyncpa [#allocation3], 1 }
 0x177   :  { %337 = vsyncpa [#allocation6], 1 }
 0x178   :  { %338 = vsyncpa [#allocation9], 1 }
 0x179   :  { %339 = vsyncpa [#allocation4], 1 }

// kernel: tpu_custom_call.1
= control target key start
LH: loop header
LB: loop body
LE: loop exit
PB: predicated region body
PF: predicated region fallthrough
CT: control target
= control target key end

     0   :  { %11 = vsyncpa [#allocation3], 0  ;;  %s652_s0 = inlined_call_operand.hbm [shape: f32[16,16], index: 0, kind: input, shape index: {}]   ;;  %s653_s1 = inlined_call_operand.hbm [shape: f32[16,128], index: 1, kind: input, shape index: {}]   ;;  %s654_s2 = inlined_call_operand.hbm [shape: f32[16,256], index: 2, kind: input, shape index: {}]   ;;  %s655_s3 = inlined_call_operand.hbm [shape: f32[128,256], index: 3, kind: input, shape index: {}]   ;;  %s656_s4 = inlined_call_operand.vmem [shape: f32[1,256], index: 4, kind: input, shape index: {}]   ;;  %s657_s5 = inlined_call_operand.vmem [shape: f32[1,128], index: 5, kind: input, shape index: {}]   ;;  %s658_s6 = inlined_call_operand.hbm [shape: f32[16,128], index: 6, kind: output, shape index: {}]  }
   0x1   :  { %12 = vsyncpa [#allocation6], 0 }
   0x2   :  { %13 = vsyncpa [#allocation9], 0 }
   0x3   :  { %14 = vsyncpa [#allocation4], 0  ;;  %s519_s21 = smov [#allocation5]   ;;  %s520_s23 = smov [#allocation2]  }
   0x4   :  { %s32_s22 = sshll.u32 %s519_s21, 4  ;;  %s20_s24 = sshll.u32 %s520_s23, 4  ;;  %s33_s22 = int_to_ptr.vmem [resolvable:$true] %s32_s22  ;;  %s564_s24 = int_to_ptr.vmem [resolvable:$true] %s20_s24 }
   0x5   :  { %s401_s27 = scalar_lea.hbm %s653_s1, 256 }
   0x6   :  { %p402_p0 = scmp.ne.s32.totalorder %s653_s1, %s401_s27  ;;  %p405_p1 = scmp.lt.u32.totalorder %s401_s27, %s653_s1 }
   0x8   :  { %p407_p2 = pnand %p405_p1, %p402_p0 }
   0xa   :  { %410 = shalt.err (!%p407_p2)
}
   0xb   :  { %s411_s8 = scalar_lea.vmem %s33_s22, 256  ;;  %p416_p4 = scmp.lt.s32.totalorder %s33_s22, %s33_s22 }
   0xc   :  { %p412_p3 = scmp.ne.s32.totalorder %s33_s22, %s411_s8  ;;  %p417_p5 = scmp.lt.s32.totalorder %s411_s8, %s411_s8 }
   0xe   :  { %p418_p6 = por %p417_p5, %p416_p4 }
  0x10   :  { %p419_p7 = pnand %p418_p6, %p412_p3 }
  0x12   :  { %422 = shalt.err (!%p419_p7)
}
  0x13   :  { %s521_s9 = smov 128   ;;  %s522_s10 = smov 8  }
  0x14   :  { %38 = dma.hbm_to_vmem [thread:$0]  %s653_s1, 256, %s33_s22, [#allocation6], %s521_s9, %s521_s9, %s522_s10  }
  0x15   :  { %s423_s15 = scalar_lea.hbm %s652_s0, 256 }
  0x16   :  { %p424_p8 = scmp.ne.s32.totalorder %s652_s0, %s423_s15  ;;  %p427_p9 = scmp.lt.u32.totalorder %s423_s15, %s652_s0 }
  0x18   :  { %p429_p10 = pnand %p427_p9, %p424_p8 }
  0x1a   :  { %432 = shalt.err (!%p429_p10)
}
  0x1b   :  { %s433_s20 = scalar_lea.vmem %s564_s24, 256  ;;  %p438_p12 = scmp.lt.s32.totalorder %s564_s24, %s564_s24 }
  0x1c   :  { %p434_p11 = scmp.ne.s32.totalorder %s564_s24, %s433_s20  ;;  %p439_p13 = scmp.lt.s32.totalorder %s433_s20, %s433_s20 }
  0x1e   :  { %p440_p0 = por %p439_p13, %p438_p12 }
  0x20   :  { %p441_p1 = pnand %p440_p0, %p434_p11 }
  0x22   :  { %444 = shalt.err (!%p441_p1)
}
  0x23   :  { %26 = dma.hbm_to_vmem [thread:$0]  %s652_s0, 256, %s564_s24, [#allocation3], %s521_s9, %s521_s9, %s522_s10  }
  0x24   :  { %s523_s22 = smov [#allocation7]   ;;  %s445_s27 = scalar_lea.hbm %s654_s2, 512 }
  0x25   :  { %s44_s23 = sshll.u32 %s523_s22, 4  ;;  %p446_p2 = scmp.ne.s32.totalorder %s654_s2, %s445_s27  ;;  %s45_s23 = int_to_ptr.vmem [resolvable:$true] %s44_s23 }
  0x26   :  { %p449_p3 = scmp.lt.u32.totalorder %s445_s27, %s654_s2 }
  0x28   :  { %p451_p4 = pnand %p449_p3, %p446_p2 }
  0x2a   :  { %454 = shalt.err (!%p451_p4)
}
  0x2b   :  { %s455_s8 = scalar_lea.vmem %s45_s23, 512  ;;  %p460_p6 = scmp.lt.s32.totalorder %s45_s23, %s45_s23 }
  0x2c   :  { %p456_p5 = scmp.ne.s32.totalorder %s45_s23, %s455_s8  ;;  %p461_p7 = scmp.lt.s32.totalorder %s455_s8, %s455_s8 }
  0x2e   :  { %p462_p8 = por %p461_p7, %p460_p6 }
  0x30   :  { %p463_p9 = pnand %p462_p8, %p456_p5 }
  0x32   :  { %466 = shalt.err (!%p463_p9)
}
  0x33   :  { %s524_s0 = smov 256   ;;  %s525_s24 = smov 16  }
  0x34   :  { %50 = dma.hbm_to_vmem [thread:$0]  %s654_s2, 512, %s45_s23, [#allocation6], %s524_s0, %s524_s0, %s525_s24  }
  0x35   :  { %s526_s13 = smov [#allocation8]   ;;  %s467_s17 = scalar_lea.hbm %s655_s3, 4096 }
  0x36   :  { %s56_s14 = sshll.u32 %s526_s13, 4  ;;  %p468_p10 = scmp.ne.s32.totalorder %s655_s3, %s467_s17  ;;  %s57_s14 = int_to_ptr.vmem [resolvable:$true] %s56_s14 }
  0x37   :  { %p471_p11 = scmp.lt.u32.totalorder %s467_s17, %s655_s3 }
  0x39   :  { %p473_p12 = pnand %p471_p11, %p468_p10 }
  0x3b   :  { %476 = shalt.err (!%p473_p12)
}
  0x3c   :  { %s477_s21 = scalar_lea.vmem %s57_s14, 4096  ;;  %p482_p0 = scmp.lt.s32.totalorder %s57_s14, %s57_s14 }
  0x3d   :  { %p478_p13 = scmp.ne.s32.totalorder %s57_s14, %s477_s21  ;;  %p483_p1 = scmp.lt.s32.totalorder %s477_s21, %s477_s21 }
  0x3f   :  { %p484_p2 = por %p483_p1, %p482_p0 }
  0x41   :  { %p485_p3 = pnand %p484_p2, %p478_p13 }
  0x43   :  { %488 = shalt.err (!%p485_p3)
}
  0x44   :  { %62 = dma.hbm_to_vmem [thread:$0]  %s655_s3, 4096, %s57_s14, [#allocation9], %s524_s0, %s524_s0, %s525_s24  }
  0x45   :  { %511 = dma.done.wait [#allocation3], 256  }
  0x46   :  { %512 = vsyncadd [#allocation3], 4294967040 }
  0x47   :  { %513 = dma.done.wait [#allocation6], 768  }
  0x48   :  { %514 = vsyncadd [#allocation6], 4294966528 }
  0x49   :  { %515 = dma.done.wait [#allocation9], 4096  }
  0x4a   :  { %516 = vsyncadd [#allocation9], 4294963200  ;;  %v527_v0 = vmov 0.0   ;;  %v88_v1 = vld [vmem:[#allocation8 + $0x8] sm:$0xff]  ;;  %v90_v2 = vld [vmem:[#allocation8 + $0x18] sm:$0xff]  ;;  %vm196_vm0 = vcmask 130048   ;;  %v282_v62 = vlaneseq }
  0x4b   :  { %267 = vmatprep.mubr.f32.mxu0 %v527_v0  ;;  %183 = vmatprep.mubr.f32.mxu1 %v527_v0  ;;  %v87_v3 = vld [vmem:[#allocation8] sm:$0xff]  ;;  %v343_v4 = vpack.c.bf16 %v90_v2, %v88_v1  ;;  %v89_v5 = vld [vmem:[#allocation8 + $0x10] sm:$0xff]  ;;  %v92_v6 = vld [vmem:[#allocation8 + $0x28] sm:$0xff]  ;;  %s528_s26 = smov [#allocation10]  }
  0x4c   :  { %v94_v7 = vld [vmem:[#allocation8 + $0x38] sm:$0xff]  ;;  %v345_v8 = vpack.c.bf16 %v89_v5, %v87_v3  ;;  %v91_v10 = vld [vmem:[#allocation8 + $0x20] sm:$0xff]  ;;  %v93_v11 = vld [vmem:[#allocation8 + $0x30] sm:$0xff]  ;;  %v283_v1 = vshrl.u32 %v282_v62, 7  ;;  %s326_s27 = sshll.u32 %s528_s26, 4  ;;  %s327_s27 = int_to_ptr.vmem [resolvable:$true] %s326_s27 }
  0x4d   :  { %v347_v9 = vpack.c.bf16 %v94_v7, %v92_v6  ;;  %v96_v12 = vld [vmem:[#allocation8 + $0x48] sm:$0xff]  ;;  %344 = vmatprep.subr.bf16.mxu1 %v343_v4  ;;  %v98_v13 = vld [vmem:[#allocation8 + $0x58] sm:$0xff]  ;;  %v349_v14 = vpack.c.bf16 %v93_v11, %v91_v10  ;;  %v95_v16 = vld [vmem:[#allocation8 + $0x40] sm:$0xff]  ;;  %s489_s28 = scalar_lea.vmem %s327_s27, 256  ;;  %p494_p5 = scmp.lt.s32.totalorder %s327_s27, %s327_s27 }
  0x4e   :  { %346 = vmatpush1.bf16.msra.mxu1 %v345_v8  ;;  %v351_v15 = vpack.c.bf16 %v98_v13, %v96_v12  ;;  %v97_v17 = vld [vmem:[#allocation8 + $0x50] sm:$0xff]  ;;  %v100_v18 = vld [vmem:[#allocation8 + $0x68] sm:$0xff]  ;;  %v102_v19 = vld [vmem:[#allocation8 + $0x78] sm:$0xff]  ;;  %v284_v2 = vsub.s32 0, %v283_v1  ;;  %p490_p4 = scmp.ne.s32.totalorder %s327_s27, %s489_s28  ;;  %p495_p6 = scmp.lt.s32.totalorder %s489_s28, %s489_s28 }
  0x4f   :  { %348 = vmatprep.subr.bf16.mxu1 %v347_v9  ;;  %v353_v20 = vpack.c.bf16 %v97_v17, %v95_v16  ;;  %v99_v21 = vld [vmem:[#allocation8 + $0x60] sm:$0xff]  ;;  %v355_v22 = vpack.c.bf16 %v102_v19, %v100_v18  ;;  %v101_v23 = vld [vmem:[#allocation8 + $0x70] sm:$0xff]  ;;  %v84_v24 = vld [vmem:[#allocation7 + $0x8] sm:$0xff] }
  0x50   :  { %v86_v25 = vld [vmem:[#allocation7 + $0x18] sm:$0xff]  ;;  %v104_v26 = vld [vmem:[#allocation8 + $0x88] sm:$0xff]  ;;  %v83_v29 = vld [vmem:[#allocation7] sm:$0xff]  ;;  %v357_v31 = vpack.c.bf16 %v101_v23, %v99_v21  ;;  %v288_v21 = vsub.s32 1, %v283_v1  ;;  %p496_p7 = por %p495_p6, %p494_p5 }
  0x51   :  { %v106_v27 = vld [vmem:[#allocation8 + $0x98] sm:$0xff]  ;;  %v375_v28 = vpack.c.bf16 %v86_v25, %v84_v24  ;;  %v85_v30 = vld [vmem:[#allocation7 + $0x10] sm:$0xff]  ;;  %v103_v34 = vld [vmem:[#allocation8 + $0x80] sm:$0xff] }
  0x52   :  { %350 = vmatpush1.bf16.msra.mxu1 %v349_v14  ;;  %v377_v32 = vpack.c.bf16 %v85_v30, %v83_v29  ;;  %v359_v33 = vpack.c.bf16 %v106_v27, %v104_v26  ;;  %v105_v35 = vld [vmem:[#allocation8 + $0x90] sm:$0xff]  ;;  %v108_v36 = vld [vmem:[#allocation8 + $0xa8] sm:$0xff]  ;;  %v110_v37 = vld [vmem:[#allocation8 + $0xb8] sm:$0xff]  ;;  %p497_p8 = pnand %p496_p7, %p490_p4 }
  0x53   :  { %352 = vmatprep.subr.bf16.mxu1 %v351_v15  ;;  %376 = vmatprep.subr.bf16.mxu0 %v375_v28  ;;  %v81_v38 = vld [vmem:[#allocation2] sm:$0xff]  ;;  %v361_v39 = vpack.c.bf16 %v105_v35, %v103_v34  ;;  %v363_v40 = vpack.c.bf16 %v110_v37, %v108_v36  ;;  %v109_v42 = vld [vmem:[#allocation8 + $0xb0] sm:$0xff]  ;;  %v112_v43 = vld [vmem:[#allocation8 + $0xc8] sm:$0xff] }
  0x54   :  { %378 = vmatpush1.bf16.msra.mxu0 %v377_v32  ;;  %v107_v41 = vld [vmem:[#allocation8 + $0xa0] sm:$0xff]  ;;  %v114_v44 = vld [vmem:[#allocation8 + $0xd8] sm:$0xff]  ;;  %v82_v45 = vld [vmem:[#allocation2 + $0x8] sm:$0xff] }
  0x55   :  { %v365_v46 = vpack.c.bf16 %v109_v42, %v107_v41  ;;  %v367_v47 = vpack.c.bf16 %v114_v44, %v112_v43  ;;  %v111_v48 = vld [vmem:[#allocation8 + $0xc0] sm:$0xff]  ;;  %v113_v49 = vld [vmem:[#allocation8 + $0xd0] sm:$0xff]  ;;  %v116_v50 = vld [vmem:[#allocation8 + $0xe8] sm:$0xff] }
  0x56   :  { %354 = vmatpush1.bf16.msra.mxu1 %v353_v20  ;;  %v118_v51 = vld [vmem:[#allocation8 + $0xf8] sm:$0xff]  ;;  %v369_v52 = vpack.c.bf16 %v113_v49, %v111_v48  ;;  %v115_v54 = vld [vmem:[#allocation8 + $0xe0] sm:$0xff]  ;;  %v117_v55 = vld [vmem:[#allocation8 + $0xf0] sm:$0xff] }
  0x57   :  { %356 = vmatprep.subr.bf16.mxu1 %v355_v22  ;;  %340 = vmatmul.mubr.msk.f32.vlgmr.msra.gmra.mrb[0].mxu0 %vm196_vm0, %v81_v38  ;;  %v371_v53 = vpack.c.bf16 %v118_v51, %v116_v50  ;;  %v373_v56 = vpack.c.bf16 %v117_v55, %v115_v54  ;;  %v79_v57 = vld [vmem:[#allocation5] sm:$0xff]  ;;  %v80_v58 = vld [vmem:[#allocation5 + $0x8] sm:$0xff]  ;;  %v280_v3 = vld [vmem:[%s656_s4] sm:$0x3] }
  0x58   :  { %273 = vmatprep.mubr.f32.mxu0 %v527_v0  ;;  %v285_v4 = vrot.slane %v280_v3, %v284_v2  ;;  %v289_v23 = vrot.slane %v280_v3, %v288_v21  ;;  %v342_v27 = vld [vmem:[%s657_s5] ss:$0 sm:$0xff] }
  0x5a   :  { %358 = vmatpush1.bf16.msra.mxu1 %v357_v31 }
  0x5b   :  { %360 = vmatprep.subr.bf16.mxu1 %v359_v33  ;;  %341 = vmatmul.mubr.msk.f32.gmra.mrb[2].mxu0 %vm196_vm0, %v82_v45 }
  0x5e   :  { %362 = vmatpush1.bf16.msra.mxu1 %v361_v39 }
  0x5f   :  { %364 = vmatprep.subr.bf16.mxu1 %v363_v40 }
  0x62   :  { %366 = vmatpush1.bf16.msra.mxu1 %v365_v46 }
  0x63   :  { %368 = vmatprep.subr.bf16.mxu1 %v367_v47 }
  0x66   :  { %370 = vmatpush1.bf16.msra.mxu1 %v369_v52 }
  0x67   :  { %372 = vmatprep.subr.bf16.mxu1 %v371_v53 }
  0x6a   :  { %374 = vmatpush1.bf16.msra.mxu1 %v373_v56 }
  0x6d   :  { %184 = vmatmul.mubr.f32.vlgmr.msra.gmra.mrb[0].mxu1 %v79_v57 }
  0x6e   :  { %189 = vmatprep.mubr.f32.mxu1 %v527_v0 }
  0x71   :  { %190 = vmatmul.mubr.f32.gmra.mrb[2].mxu1 %v80_v58 }
 0x12a   :  { %v269_v59 = vpop.f32.mrb[0].mxu0 }
 0x12b   :  { %v271_v60 = vpop.f32.mrb[1].mxu0 }
 0x12e   :  { %v275_v61 = vpop.f32.mrb[2].mxu0 }
 0x12f   :  { %v277_v63 = vpop.f32.mrb[3].mxu0 }
 0x140   :  { %v185_v5 = vpop.f32.mrb[0].mxu1 }
 0x141   :  { %v270_v6 = vadd.f32 %v269_v59, %v185_v5  ;;  %v187_v7 = vpop.f32.mrb[1].mxu1 }
 0x142   :  { %v272_v8 = vadd.f32 %v271_v60, %v187_v7 }
 0x143   :  { %v292_v9 = vadd.f32 %v285_v4, %v270_v6 }
 0x144   :  { %v191_v0 = vpop.f32.mrb[2].mxu1  ;;  %v293_v24 = vadd.f32 %v289_v23, %v272_v8 }
 0x145   :  { %v296_v10 = vsub.f32 0.0, %v292_v9  ;;  %v276_v11 = vadd.f32 %v275_v61, %v191_v0  ;;  %v193_v12 = vpop.f32.mrb[3].mxu1 }
 0x146   :  { %v278_v13 = vadd.f32 %v277_v63, %v193_v12 }
 0x147   :  { %v298_v14 = vmul.f32 1.442695, %v296_v10  ;;  %v294_v15 = vadd.f32 %v285_v4, %v276_v11 }
 0x148   :  { %v295_v29 = vadd.f32 %v289_v23, %v278_v13 }
 0x149   :  { %393 = vpow2.f32 %v298_v14  ;;  %v297_v16 = vsub.f32 0.0, %v294_v15 }
 0x14b   :  { %v300_v17 = vmul.f32 1.442695, %v297_v16 }
 0x14d   :  { %395 = vpow2.f32 %v300_v17 }
 0x153   :  { %v394_v18 = vpop.eup %393 }
 0x154   :  { %v302_v19 = vadd.f32 1.0, %v394_v18 }
 0x156   :  { %397 = vrcp.f32 %v302_v19 }
 0x157   :  { %v396_v20 = vpop.eup %395 }
 0x158   :  { %v303_v22 = vadd.f32 1.0, %v396_v20 }
 0x15a   :  { %399 = vrcp.f32 %v303_v22 }
 0x160   :  { %v398_v25 = vpop.eup %397 }
 0x161   :  { %v306_v26 = vmul.f32 %v398_v25, %v293_v24 }
 0x163   :  { %v308_v28 = vsub.f32 %v306_v26, %v79_v57 }
 0x164   :  { %v400_v30 = vpop.eup %399 }
 0x165   :  { %v307_v31 = vmul.f32 %v400_v30, %v295_v29  ;;  %v317_v32 = vmul.f32 %v342_v27, %v308_v28 }
 0x167   :  { %v309_v33 = vsub.f32 %v307_v31, %v80_v58  ;;  %319 = vst [vmem:[#allocation10] sm:$0xff] %v317_v32 }
 0x169   :  { %v318_v34 = vmul.f32 %v342_v27, %v309_v33 }
 0x16b   :  { %320 = vst [vmem:[#allocation10 + $0x8] sm:$0xff] %v318_v34 }
 0x16c   :  { %500 = shalt.err (!%p497_p8)
}
 0x16d   :  { %s501_s30 = scalar_lea.hbm %s658_s6, 256 }
 0x16e   :  { %p502_p9 = scmp.ne.s32.totalorder %s658_s6, %s501_s30  ;;  %p505_p10 = scmp.lt.u32.totalorder %s501_s30, %s658_s6 }
 0x170   :  { %p507_p11 = pnand %p505_p10, %p502_p9 }
 0x172   :  { %510 = shalt.err (!%p507_p11)
}
 0x173   :  { %332 = dma.vmem_to_hbm [thread:$0]  %s327_s27, 256, %s658_s6, [#allocation4], %s521_s9, %s521_s9, %s522_s10  }
 0x174   :  { %517 = dma.done.wait [#allocation4], 256  }
 0x175   :  { %518 = vsyncadd [#allocation4], 4294967040 }
 0x176   :  { %336 = vsyncpa [#allocation3], 1 }
 0x177   :  { %337 = vsyncpa [#allocation6], 1 }
 0x178   :  { %338 = vsyncpa [#allocation9], 1 }
 0x179   :  { %339 = vsyncpa [#allocation4], 1 }

</bundles_post_ra>
